<compile_context>
chip_gen: v7x
topology: tpu7x:2x2x1
jax: 0.10.0
libtpu: 0.0.40
codegen_flags: <defaults>
</compile_context>

<pallas_src>
import jax
import jax.numpy as jnp
from jax.experimental import pallas as pl
from jax.experimental.pallas import tpu as pltpu

DTYPE = jnp.float32        # activation / accumulation dtype
MM_DTYPE = jnp.bfloat16    # MXU operand dtype
BN_EPS = 1e-3


def _round_up(v, m):
    return ((v + m - 1) // m) * m


def _largest_divisor(n, cap):
    cap = max(1, min(cap, n))
    for d in range(cap, 0, -1):
        if n % d == 0:
            return d
    return n


# ----------------------------------------------------------------------------
# Pallas kernels
# ----------------------------------------------------------------------------
def _mm_bias_silu_kernel(x_ref, w_ref, b_ref, o_ref, acc_ref):
    # x: (tm, tk) bf16   w: (tk, tn) bf16 (BN scale folded in)
    # b: (1, tn)  f32    o: (tm, tn) f32   acc: (tm, tn) f32 scratch
    @pl.when(pl.program_id(2) == 0)
    def _():
        acc_ref[...] = jnp.zeros_like(acc_ref)

    acc_ref[...] += jnp.dot(x_ref[...], w_ref[...],
                            preferred_element_type=jnp.float32)

    @pl.when(pl.program_id(2) == pl.num_programs(2) - 1)
    def _():
        y = acc_ref[...] + b_ref[...]                       # folded BN bias (eval mode)
        o_ref[...] = (y * jax.nn.sigmoid(y)).astype(o_ref.dtype)   # SiLU


def _maxpool_kernel(x_ref, o_ref):
    # x: (tr, 2, Wo, 2*C)   o: (tr, Wo, C)
    c = o_ref.shape[-1]
    v = x_ref[...]
    m = jnp.maximum(v[:, 0], v[:, 1])                       # vertical 2-max
    o_ref[...] = jnp.maximum(m[:, :, :c], m[:, :, c:])      # horizontal 2-max


# ----------------------------------------------------------------------------
# Fused matmul + BN-bias + SiLU (tiled M x Cout x K grid, bf16 MXU, f32 acc)
# ----------------------------------------------------------------------------
def fused_matmul_bias_silu(x, w, bias):
    """x: (M, K), w: (K, Cout) with BN scale pre-folded, bias: (Cout,) -> (M, Cout) f32."""
    M, K = x.shape
    Cout = w.shape[1]

    # Tile selection (works across v5e/v6e/v7x VMEM budgets: ~2 MiB/step).
    tm = min(256, _round_up(M, 8))
    tn = _round_up(Cout, 128) if Cout <= 256 else 256
    tk = _round_up(K, 128) if K <= 1024 else 512

    Mp, Np, Kp = _round_up(M, tm), _round_up(Cout, tn), _round_up(K, tk)

    xp = x.astype(MM_DTYPE)
    if (Mp, Kp) != (M, K):
        xp = jnp.pad(xp, ((0, Mp - M), (0, Kp - K)))
    wp = w.astype(MM_DTYPE)
    if (Kp, Np) != (K, Cout):
        wp = jnp.pad(wp, ((0, Kp - K), (0, Np - Cout)))
    bp = bias.astype(DTYPE)
    if Np != Cout:
        bp = jnp.pad(bp, (0, Np - Cout))
    bp = bp.reshape(1, Np)

    out = pl.pallas_call(
        _mm_bias_silu_kernel,
        out_shape=jax.ShapeDtypeStruct((Mp, Np), DTYPE),
        grid=(Mp // tm, Np // tn, Kp // tk),
        in_specs=[
            pl.BlockSpec((tm, tk), lambda i, j, k: (i, k)),
            pl.BlockSpec((tk, tn), lambda i, j, k: (k, j)),
            pl.BlockSpec((1, tn), lambda i, j, k: (0, j)),
        ],
        out_specs=pl.BlockSpec((tm, tn), lambda i, j, k: (i, j)),
        scratch_shapes=[pltpu.VMEM((tm, tn), jnp.float32)],
        compiler_params=pltpu.CompilerParams(
            dimension_semantics=("parallel", "parallel", "arbitrary")),
    )(xp, wp, bp)
    return out[:M, :Cout]


# ----------------------------------------------------------------------------
# Blocked MaxPool2d(2, 2)
# ----------------------------------------------------------------------------
def maxpool2x2(x):
    """x: NHWC, kernel=2, stride=2 (matches nn.MaxPool2d(2,2) floor behavior)."""
    N, H, W, C = x.shape
    Ho, Wo = H // 2, W // 2
    if (H, W) != (2 * Ho, 2 * Wo):
        x = x[:, :2 * Ho, :2 * Wo, :]
    # Free (contiguous) reshape: vertical pair -> axis 1, horizontal pair folded
    # into the lane dim. Single input array, no strided-slice HBM copies.
    xv = x.reshape(N * Ho, 2, Wo, 2 * C)
    R = N * Ho
    row_bytes = 2 * Wo * 2 * C * x.dtype.itemsize
    tr = _largest_divisor(R, (4 << 20) // max(row_bytes, 1))
    out = pl.pallas_call(
        _maxpool_kernel,
        out_shape=jax.ShapeDtypeStruct((R, Wo, C), x.dtype),
        grid=(R // tr,),
        in_specs=[pl.BlockSpec((tr, 2, Wo, 2 * C), lambda i: (i, 0, 0, 0))],
        out_specs=pl.BlockSpec((tr, Wo, C), lambda i: (i, 0, 0)),
        compiler_params=pltpu.CompilerParams(
            dimension_semantics=("parallel",)),
    )(xv)
    return out.reshape(N, Ho, Wo, C)


# ----------------------------------------------------------------------------
# Conv + BN + SiLU (im2col glue in plain JAX, fused matmul in Pallas)
# ----------------------------------------------------------------------------
def conv_apply(p, x):
    """p: param dict; x: NHWC."""
    w = p["w"]                       # (Cout, Cin, k, k)  -- PyTorch layout
    stride = p["stride"]
    Cout, Cin, kh, kw = w.shape
    pad = kh // 2                    # autopad
    N, H, W, C = x.shape
    assert C == Cin
    Ho = (H + 2 * pad - kh) // stride + 1
    Wo = (W + 2 * pad - kw) // stride + 1

    if kh == 1:
        xs = x if stride == 1 else x[:, ::stride, ::stride, :]
        patches = xs.reshape(N * Ho * Wo, Cin)
        wm = w.reshape(Cout, Cin).T
    else:
        # TODO(synk): replace im2col for stride-1 3x3 convs with an in-kernel
        #             9-tap shifted-accumulation (grid axis over kernel offsets)
        #             to avoid the 9x HBM round trip of the patch matrix.
        xp = jnp.pad(x, ((0, 0), (pad, pad), (pad, pad), (0, 0)))
        cols = []
        for i in range(kh):
            for j in range(kw):
                cols.append(
                    xp[:, i:i + Ho * stride:stride, j:j + Wo * stride:stride, :])
        patches = jnp.stack(cols, axis=3).reshape(N * Ho * Wo, kh * kw * Cin)
        wm = jnp.transpose(w, (2, 3, 1, 0)).reshape(kh * kw * Cin, Cout)

    # Eval-mode BN fold: (x@w)*scale + bias == x@(w*scale) + bias
    scale = p["gamma"] / jnp.sqrt(p["var"] + BN_EPS)
    bias = p["beta"] - p["mean"] * scale
    wm = wm * scale[None, :]
    out = fused_matmul_bias_silu(patches, wm, bias)
    return out.reshape(N, Ho, Wo, Cout)


# ----------------------------------------------------------------------------
# Deterministic parameter init (synthetic, no checkpoint load)
# ----------------------------------------------------------------------------
class KeyGen:
    def __init__(self, key):
        self.key = key

    def next(self):
        self.key, sub = jax.random.split(self.key)
        return sub


def init_conv(kg, c1, c2, k, s):
    w = jax.random.normal(kg.next(), (c2, c1, k, k), DTYPE) * 0.05
    gamma = jax.random.uniform(kg.next(), (c2,), DTYPE, 0.5, 1.5)
    beta = jax.random.normal(kg.next(), (c2,), DTYPE) * 0.1
    mean = jax.random.normal(kg.next(), (c2,), DTYPE) * 0.1
    var = jax.random.uniform(kg.next(), (c2,), DTYPE, 0.5, 1.5)
    return {"w": w, "gamma": gamma, "beta": beta, "mean": mean,
            "var": var, "stride": s}


def init_block(kg, c1, c2, c3, n, ids, e=1):
    c_ = int(c2 * e)
    return {
        "cv1": init_conv(kg, c1, c_, 1, 1),
        "cv2": init_conv(kg, c1, c_, 1, 1),
        "cv3": [init_conv(kg, c_ if i == 0 else c2, c2, 3, 1) for i in range(n)],
        "cv4": init_conv(kg, c_ * 2 + c2 * (len(ids) - 2), c3, 1, 1),
        "ids": list(ids),
    }


def init_transition(kg, c1, c2):
    return {
        "cv1": init_conv(kg, c1, c2, 1, 1),
        "cv2": init_conv(kg, c1, c2, 1, 1),
        "cv3": init_conv(kg, c2, c2, 3, 2),
    }


def init_backbone(key, transition_channels, block_channels, n, phi):
    ids = {"l": [-1, -3, -5, -6], "x": [-1, -3, -5, -7, -8]}[phi]
    t, b = transition_channels, block_channels
    kg = KeyGen(key)
    return {
        "stem": [init_conv(kg, 3, t, 3, 1),
                 init_conv(kg, t, 2 * t, 3, 2),
                 init_conv(kg, 2 * t, 2 * t, 3, 1)],
        "dark2": {"conv": init_conv(kg, 2 * t, 4 * t, 3, 2),
                  "block": init_block(kg, 4 * t, 2 * b, 8 * t, n, ids)},
        "dark3": {"trans": init_transition(kg, 8 * t, 4 * t),
                  "block": init_block(kg, 8 * t, 4 * b, 16 * t, n, ids)},
        "dark4": {"trans": init_transition(kg, 16 * t, 8 * t),
                  "block": init_block(kg, 16 * t, 8 * b, 32 * t, n, ids)},
        "dark5": {"trans": init_transition(kg, 32 * t, 16 * t),
                  "block": init_block(kg, 32 * t, 8 * b, 32 * t, n, ids)},
    }


# ----------------------------------------------------------------------------
# Forward passes (NHWC internally)
# ----------------------------------------------------------------------------
def block_forward(p, x):
    x1 = conv_apply(p["cv1"], x)
    x2 = conv_apply(p["cv2"], x)
    x_all = [x1, x2]
    for cv in p["cv3"]:
        x2 = conv_apply(cv, x2)
        x_all.append(x2)
    cat = jnp.concatenate([x_all[i] for i in p["ids"]], axis=-1)
    return conv_apply(p["cv4"], cat)


def transition_forward(p, x):
    x1 = conv_apply(p["cv1"], maxpool2x2(x))
    x2 = conv_apply(p["cv3"], conv_apply(p["cv2"], x))
    return jnp.concatenate([x2, x1], axis=-1)


def backbone_forward(params, x_nchw):
    x = jnp.transpose(x_nchw, (0, 2, 3, 1)).astype(DTYPE)   # NCHW -> NHWC
    for p in params["stem"]:
        x = conv_apply(p, x)
    x = conv_apply(params["dark2"]["conv"], x)
    x = block_forward(params["dark2"]["block"], x)
    x = block_forward(params["dark3"]["block"],
                      transition_forward(params["dark3"]["trans"], x))
    feat1 = x
    x = block_forward(params["dark4"]["block"],
                      transition_forward(params["dark4"]["trans"], x))
    feat2 = x
    x = block_forward(params["dark5"]["block"],
                      transition_forward(params["dark5"]["trans"], x))
    feat3 = x
    # back to PyTorch NCHW layout for the returned features
    to_nchw = lambda f: jnp.transpose(f, (0, 3, 1, 2))
    return to_nchw(feat1), to_nchw(feat2), to_nchw(feat3)


# TODO(synk): pretrained checkpoint loading (torch.hub) intentionally omitted;
#             parameters are deterministic synthetic values.

if __name__ == "__main__":
    key = jax.random.PRNGKey(0)
    k_param, k_x = jax.random.split(key)

    # small but structurally faithful config: phi='l', n=4 (required by ids)
    transition_channels, block_channels, n, phi = 8, 8, 4, "l"
    params = init_backbone(k_param, transition_channels, block_channels, n, phi)

    # input must be divisible by 32 (5 stride-2 stages); NCHW like PyTorch
    x = jax.random.normal(k_x, (2, 3, 32, 32), DTYPE)

    feat1, feat2, feat3 = backbone_forward(params, x)
    jax.block_until_ready((feat1, feat2, feat3))

    # expected shapes: feat1 (2,128,4,4), feat2 (2,256,2,2), feat3 (2,256,1,1)
    assert feat1.shape == (2, 16 * transition_channels, 4, 4)
    assert feat2.shape == (2, 32 * transition_channels, 2, 2)
    assert feat3.shape == (2, 32 * transition_channels, 1, 1)

    print("KERNEL_OK")
</pallas_src>

<mosaic_0001>
module attributes {stable_mosaic.version = 11 : i64} {
  func.func @_mm_bias_silu_kernel(%arg0: i32, %arg1: i32, %arg2: i32, %arg3: memref<256x128xbf16, #tpu.memory_space<vmem>>, %arg4: memref<128x128xbf16, #tpu.memory_space<vmem>>, %arg5: memref<1x128xf32, #tpu.memory_space<vmem>>, %arg6: memref<256x128xf32, #tpu.memory_space<vmem>>, %arg7: memref<256x128xf32, #tpu.memory_space<vmem>>) attributes {dimension_semantics = [#tpu.dimension_semantics<parallel>, #tpu.dimension_semantics<parallel>, #tpu.dimension_semantics<arbitrary>], iteration_bounds = array<i64: 8, 1, 1>, scalar_prefetch = 0 : i64, scratch_operands = 1 : i64, tpu.core_type = #tpu.core_type<tc>, window_params = [{transform_indices = @transform_0, window_bounds = array<i64: 256, 128>}, {transform_indices = @transform_1, window_bounds = array<i64: 128, 128>}, {transform_indices = @transform_2, window_bounds = array<i64: 1, 128>}, {transform_indices = @transform_3, window_bounds = array<i64: 256, 128>}]} {
    %c0_i32 = arith.constant 0 : i32
    %0 = arith.cmpi eq, %arg2, %c0_i32 : i32
    %1 = arith.extui %0 : i1 to i32
    %c0_i32_0 = arith.constant 0 : i32
    %2 = arith.cmpi ne, %1, %c0_i32_0 : i32
    scf.if %2 {
      %cst_10 = arith.constant 0.000000e+00 : f32
      %12 = vector.broadcast %cst_10 : f32 to vector<256x128xf32>
      %c0_11 = arith.constant 0 : index
      %c0_12 = arith.constant 0 : index
      %13 = vector.load %arg7[%c0_11, %c0_12] : memref<256x128xf32, #tpu.memory_space<vmem>>, vector<256x128xf32>
      tpu.vector_store %arg7[%c0_11, %c0_12], %12 {strides = array<i32>} : memref<256x128xf32, #tpu.memory_space<vmem>>, vector<256x128xf32>,
    } else {
    }
    %c0 = arith.constant 0 : index
    %c0_1 = arith.constant 0 : index
    %3 = vector.load %arg7[%c0, %c0_1] : memref<256x128xf32, #tpu.memory_space<vmem>>, vector<256x128xf32>
    %c0_2 = arith.constant 0 : index
    %c0_3 = arith.constant 0 : index
    %4 = vector.load %arg3[%c0_2, %c0_3] : memref<256x128xbf16, #tpu.memory_space<vmem>>, vector<256x128xbf16>
    %c0_4 = arith.constant 0 : index
    %c0_5 = arith.constant 0 : index
    %5 = vector.load %arg4[%c0_4, %c0_5] : memref<128x128xbf16, #tpu.memory_space<vmem>>, vector<128x128xbf16>
    %cst = arith.constant dense<0.000000e+00> : vector<256x128xf32>
    %6 = tpu.matmul %4, %5, %cst {dimension_numbers = #tpu.dot_dimension_numbers<[1], [0], [0], [1], [0, 0, 1, 1], [], []>} : vector<256x128xbf16>, vector<128x128xbf16>, vector<256x128xf32> -> vector<256x128xf32>
    %7 = arith.addf %3, %6 : vector<256x128xf32>
    %c0_6 = arith.constant 0 : index
    %c0_7 = arith.constant 0 : index
    %8 = vector.load %arg7[%c0_6, %c0_7] : memref<256x128xf32, #tpu.memory_space<vmem>>, vector<256x128xf32>
    tpu.vector_store %arg7[%c0_6, %c0_7], %7 {strides = array<i32>} : memref<256x128xf32, #tpu.memory_space<vmem>>, vector<256x128xf32>,
    %c0_i32_8 = arith.constant 0 : i32
    %9 = arith.cmpi eq, %arg2, %c0_i32_8 : i32
    %10 = arith.extui %9 : i1 to i32
    %c0_i32_9 = arith.constant 0 : i32
    %11 = arith.cmpi ne, %10, %c0_i32_9 : i32
    scf.if %11 {
      %c0_10 = arith.constant 0 : index
      %c0_11 = arith.constant 0 : index
      %12 = vector.load %arg7[%c0_10, %c0_11] : memref<256x128xf32, #tpu.memory_space<vmem>>, vector<256x128xf32>
      %c0_12 = arith.constant 0 : index
      %c0_13 = arith.constant 0 : index
      %13 = vector.load %arg5[%c0_12, %c0_13] : memref<1x128xf32, #tpu.memory_space<vmem>>, vector<1x128xf32>
      %14 = vector.broadcast %13 : vector<1x128xf32> to vector<256x128xf32>
      %15 = arith.addf %12, %14 : vector<256x128xf32>
      %16 = arith.negf %15 : vector<256x128xf32>
      %17 = math.exp %16 : vector<256x128xf32>
      %cst_14 = arith.constant 1.000000e+00 : f32
      %18 = vector.broadcast %cst_14 : f32 to vector<256x128xf32>
      %19 = arith.addf %18, %17 : vector<256x128xf32>
      %20 = arith.divf %18, %19 : vector<256x128xf32>
      %21 = arith.mulf %15, %20 : vector<256x128xf32>
      %c0_15 = arith.constant 0 : index
      %c0_16 = arith.constant 0 : index
      %22 = vector.load %arg6[%c0_15, %c0_16] : memref<256x128xf32, #tpu.memory_space<vmem>>, vector<256x128xf32>
      tpu.vector_store %arg6[%c0_15, %c0_16], %21 {strides = array<i32>} : memref<256x128xf32, #tpu.memory_space<vmem>>, vector<256x128xf32>,
    } else {
    }
    return
  }
  func.func @transform_0(%arg0: i32, %arg1: i32, %arg2: i32) -> (i32, i32) {
    %c0_i32 = arith.constant 0 : i32
    return %arg0, %arg2 : i32, i32
  }
  func.func @transform_1(%arg0: i32, %arg1: i32, %arg2: i32) -> (i32, i32) {
    %c0_i32 = arith.constant 0 : i32
    return %arg2, %arg1 : i32, i32
  }
  func.func @transform_2(%arg0: i32, %arg1: i32, %arg2: i32) -> (i32, i32) {
    %c0_i32 = arith.constant 0 : i32
    %c0_i32_0 = arith.constant 0 : i32
    return %c0_i32, %arg1 : i32, i32
  }
  func.func @transform_3(%arg0: i32, %arg1: i32, %arg2: i32) -> (i32, i32) {
    %c0_i32 = arith.constant 0 : i32
    return %arg0, %arg1 : i32, i32
  }
}

</mosaic_0001>

<bundles_post_ra>
// kernel: tpu_custom_call.1
= control target key start
LH: loop header
LB: loop body
LE: loop exit
PB: predicated region body
PF: predicated region fallthrough
CT: control target
= control target key end

     0   :  { %8 = vsyncpa [#allocation4], 0  ;;  %s2239_s0 = inlined_call_operand.hbm [shape: bf16[2048,128], index: 0, kind: input, shape index: {}]   ;;  %s2240_s1 = inlined_call_operand.hbm [shape: bf16[128,128], index: 1, kind: input, shape index: {}]   ;;  %s2241_s2 = inlined_call_operand.vmem [shape: f32[1,128], index: 2, kind: input, shape index: {}]   ;;  %s2242_s3 = inlined_call_operand.hbm [shape: f32[2048,128], index: 3, kind: output, shape index: {}]  }
   0x1   :  { %10 = vsyncpa [#allocation4 + $0x1], 0 }
   0x2   :  { %11 = vsyncpa [#allocation7], 0 }
   0x3   :  { %12 = vsyncpa [#allocation5], 0 }
   0x4   :  { %14 = vsyncpa [#allocation5 + $0x1], 0  ;;  %s1768_s12 = smov 0   ;;  %s1770_s13 = smov 0  }
   0x5   :  { %s1772_s14 = smov 0   ;;  %s1774_s15 = smov 0  }
   0x6   :  { %s1776_s16 = smov 0   ;;  %s1778_s17 = smov 0  }
   0x7 LB: > { %s1201_s18 = sadd.s32 4294967295, %s1739_s17   ;;  %s1202_s19 = sadd.s32 4294967294, %s1739_s17   ;;  %s1739_s17 = sphi %s1778_s17, %s20_s17   ;;  %s1735_s16 = sphi %s1776_s16, %s2265_s16   ;;  %s1731_s15 = sphi %s1774_s15, %s2264_s15   ;;  %s1727_s14 = sphi %s1772_s14, %s2263_s14   ;;  %s1723_s13 = sphi %s1770_s13, %s2262_s13   ;;  %s1719_s12 = sphi %s1768_s12, %s2261_s12  }
   0x8   : > { %p61_p0 = scmp.ne.s32.totalorder %s1723_s13, %s1719_s12  ;;  %p1802_p1 = scmp.eq.s32.totalorder %s1201_s18, 0 }
   0x9   : > { %p1806_p2 = scmp.eq.s32.totalorder %s1201_s18, 7  ;;  %p147_p3 = scmp.eq.s32.totalorder %s1202_s19, 7 }
   0xa   : > { %s2247_s20 = scalar_select %p1802_p1, 1, 0 }
   0xb   : > { %s2248_s21 = scalar_select %p1806_p2, 1, 0 }
   0xc   : > { %p1812_p4 = por %p1802_p1, %p61_p0  ;;  %p1203_p5 = scmp.ge.s32.totalorder %s1739_s17, 1 }
   0xd   : > { %p1817_p6 = por %p147_p3, %p61_p0  ;;  %p154_p7 = scmp.lt.s32.totalorder %s1739_s17, 9 }
   0xe   : > { %s2249_s22 = scalar_select %p1812_p4, 1, 0 }
   0xf   : > { %s2250_s23 = scalar_select %p1817_p6, 1, 0 }
  0x10   : > { %p1822_p8 = pnand %p1203_p5, %p154_p7  ;;  %s1741_s25 = smov [#allocation6]  }
  0x11   : > { %s170_s26 = sshll.u32 %s1741_s25, 4  ;;  %s39_s28 = sadd.s32 1, %s1735_s16  ;;  %s171_s26 = int_to_ptr.vmem [resolvable:$true] %s170_s26 }
  0x12   : > { %s2251_s24 = scalar_select %p1822_p8, 1, 0 }
  0x13   : > { %p1374_p9 = pneg %p1822_p8  ;;  %s1595_s4 = scalar_lea.hbm %s2240_s1, 1024 }
  0x14   : > { %p1596_p11 = scmp.ne.s32.totalorder %s2240_s1, %s1595_s4  ;;  %p1602_p3 = scmp.lt.u32.totalorder %s1595_s4, %s2240_s1 }
  0x15   : > { %p1830_p10 = pnand %p1374_p9, %p1802_p1 }
  0x17   : > { %p1597_p12 = pneg %p1830_p10 }
  0x19   : > { %p1598_p13 = pnand %p1597_p12, %p1596_p11 }
  0x1b   : > { %p1599_p0 = pneg %p1598_p13 }
  0x1d   : > { %p1604_p5 = pnand %p1602_p3, %p1599_p0 }
  0x1f   : > { %1607 = shalt.err (!%p1604_p5)
}
  0x20   : > { %s1608_s9 = scalar_lea.vmem %s171_s26, 1024  ;;  %p1616_p1 = scmp.lt.s32.totalorder %s171_s26, %s171_s26 }
  0x21   : > { %p1609_p7 = scmp.ne.s32.totalorder %s171_s26, %s1608_s9  ;;  %p1617_p4 = scmp.lt.s32.totalorder %s1608_s9, %s1608_s9 }
  0x23   : > { %p1611_p9 = pnand %p1609_p7, %p1597_p12  ;;  %p1618_p8 = por %p1617_p4, %p1616_p1 }
  0x25   : > { %p1612_p6 = pneg %p1611_p9 }
  0x27   : > { %p1619_p2 = pnand %p1618_p8, %p1612_p6 }
  0x29   : > { %1622 = shalt.err (!%p1619_p2)
}
  0x2a   : > { %s1742_s10 = smov 64   ;;  %s1743_s11 = smov 4  }
  0x2b   : > { %1377 = dma.hbm_to_vmem [thread:$0]  (!%p1830_p10), %s2240_s1, 1024, %s171_s26, [#allocation7], %s1742_s10, %s1742_s10, %s1743_s11  }
  0x2c   : > { %p41_p1 = scmp.ge.s32.totalorder %s39_s28, 8  ;;  %s48_s25 = sadd.s32 1, %s1727_s14 }
  0x2d   : > { %p55_p2 = scmp.ne.s32.totalorder %s1727_s14, %s1723_s13  ;;  %p56_p4 = scmp.eq.s32.totalorder %s1739_s17, 0 }
  0x2e   : > { %s2267_s28 = smov (%p41_p1, %s39_s28), 0  ;;  %p2254_p8 = scmp.ne.s32.totalorder %s2248_s21, 0 }
  0x2f   : > { %p1860_p6 = por %p56_p4, %p55_p2  ;;  %s43_s30 = ssub.s32 %s1735_s16, %s2267_s28 }
  0x30   : > { %p1866_p11 = por %p2254_p8, %p55_p2  ;;  %p1387_p12 = scmp.lt.s32.totalorder %s1739_s17, 8 }
  0x31   : > { %p46_p10 = scmp.eq.s32.totalorder %s43_s30, 0  ;;  %s190_s26 = sand.u32 1, %s1727_s14  }
  0x32   : > { %s1207_s4 = sshll.u32 %s190_s26, 7  ;;  %s1276_s6 = sshll.u32 %s1735_s16, 11 }
  0x33   : > { %s1875_s5 = scalar_select %p46_p10, %s1727_s14, %s48_s25  }
  0x34   : > { %s1881_s9 = scalar_lea.hbm %s2239_s0, %s1276_s6  ;;  %s194_s21 = scalar_lea.vmem [#allocation3], %s1207_s4 }
  0x35   : > { %s202_s18 = sshll.u32 %s194_s21, 4  ;;  %p1887_p13 = pnand %p1387_p12, %p1860_p6  ;;  %s1883_s18 = int_to_ptr.vmem [resolvable:$true] %s202_s18 }
  0x36   : > { %s1891_s25 = scalar_lea.sflag [#allocation4], %s190_s26  ;;  %s1623_s30 = scalar_lea.hbm %s1881_s9, 2048 }
  0x37   : > { %p1624_p0 = scmp.ne.s32.totalorder %s1881_s9, %s1623_s30  ;;  %p1625_p3 = pneg %p1887_p13 }
  0x38   : > { %s1628_s29 = scalar_lea.hbm %s2239_s0, 16384  ;;  %p1629_p9 = scmp.lt.u32.totalorder %s1881_s9, %s2239_s0 }
  0x39   : > { %p1626_p5 = pnand %p1625_p3, %p1624_p0  ;;  %p1630_p1 = scmp.lt.u32.totalorder %s1628_s29, %s1623_s30 }
  0x3a   : > { %p1632_p4 = scmp.lt.u32.totalorder %s1623_s30, %s1881_s9 }
  0x3b   : > { %p1627_p7 = pneg %p1626_p5  ;;  %p1631_p2 = por %p1630_p1, %p1629_p9 }
  0x3d   : > { %p1633_p6 = por %p1632_p4, %p1631_p2 }
  0x3f   : > { %p1634_p8 = pnand %p1633_p6, %p1627_p7 }
  0x41   : > { %1637 = shalt.err (!%p1634_p8)
}
  0x42   : > { %s1638_s26 = scalar_lea.vmem %s1883_s18, 2048  ;;  %s1744_s21 = smov [#allocation3]  }
  0x43   : > { %p1639_p12 = scmp.ne.s32.totalorder %s1883_s18, %s1638_s26  ;;  %s1643_s4 = sshll.u32 %s1744_s21, 4  ;;  %s1644_s4 = int_to_ptr.vmem [resolvable:$false] %s1643_s4 }
  0x44   : > { %s1645_s6 = scalar_lea.vmem %s1644_s4, 4096  ;;  %p1646_p5 = scmp.lt.s32.totalorder %s1883_s18, %s1644_s4 }
  0x45   : > { %p1641_p10 = pnand %p1639_p12, %p1625_p3  ;;  %p1647_p9 = scmp.lt.s32.totalorder %s1645_s6, %s1638_s26 }
  0x47   : > { %p1642_p0 = pneg %p1641_p10  ;;  %p1648_p1 = por %p1647_p9, %p1646_p5 }
  0x49   : > { %p1649_p2 = pnand %p1648_p1, %p1642_p0 }
  0x4b   : > { %1652 = shalt.err (!%p1649_p2)
}
  0x4c   : > { %1381 = dma.hbm_to_vmem [thread:$0]  (!%p1887_p13), %s1881_s9, 2048, %s1883_s18, %s1891_s25, %s1742_s10, %s1742_s10, %s1743_s11  }
  0x4d   : > { %p2257_p3 = scmp.ne.s32.totalorder %s2251_s24, 0 }
  0x4e   : > { %s1925_s30 = sand.u32 (!%p2257_p3), 1, %s1723_s13   ;;  %p2258_p7 = scmp.ne.s32.totalorder (!%p2257_p3), %s2249_s22, 0 }
  0x4f   : > { %214 = sbr.rel (%p2257_p3) target bundleno = 439 (0x1b7), region = 32  ;;  %s1211_s29 = sshll.u32 (!%p2257_p3), %s1925_s30, 7 }
  0x50   : > { %s217_s7 = scalar_lea.sflag (!%p2257_p3), [#allocation4], %s1925_s30  ;;  %s1929_s8 = scalar_lea.vmem (!%p2257_p3), [#allocation3], %s1211_s29 }
  0x56   : > { %1706 = dma.done.wait (%p2258_p7), %s217_s7, 2048  }
  0x57   : > { %1708 = vsyncadd (%p2258_p7), %s217_s7, 4294965248  ;;  %p2259_p13 = scmp.ne.s32.totalorder %s2247_s20, 0 }
  0x59   : > { %1710 = dma.done.wait (%p2259_p13), [#allocation7], 1024  }
  0x5a   : > { %1712 = vsyncadd (%p2259_p13), [#allocation7], 4294966272  ;;  %v1443_v0 = vld [vmem:[#allocation6] sm:$0xff]   ;;  %v1444_v1 = vld [vmem:[#allocation6 + $0x8] sm:$0xff]   ;;  %s1213_s24 = sshll.u32 %s1925_s30, 8  ;;  %s1277_s11 = sshll.u32 %s1731_s15, 12 }
  0x5b   : > { %1302 = vmatprep.subr.bf16.mxu0 %v1443_v0  ;;  %1350 = vmatprep.subr.bf16.mxu1 %v1443_v0  ;;  %v1445_v2 = vld [vmem:[#allocation6 + $0x10] sm:$0xff]   ;;  %v1446_v3 = vld [vmem:[#allocation6 + $0x18] sm:$0xff]   ;;  %v1451_v4 = vld [vmem:[%s1929_s8] sm:$0xff]   ;;  %s2063_s10 = scalar_lea.vmem [#allocation8], %s1213_s24  ;;  %s2185_s15 = scalar_lea.hbm %s2242_s3, %s1277_s11 }
  0x5c   : > { %1303 = vmatpush3.bf16.msra.mxu0 %v1443_v0  ;;  %1358 = vmatpush3.bf16.msra.mxu1 %v1443_v0  ;;  %v1452_v5 = vld [vmem:[%s1929_s8 + $0x40] sm:$0xff]   ;;  %v1448_v7 = vld [vmem:[#allocation6 + $0x28] sm:$0xff]   ;;  %v1449_v8 = vld [vmem:[#allocation6 + $0x30] sm:$0xff]   ;;  %s1087_s9 = sshll.u32 %s2063_s10, 4  ;;  %s1073_s25 = scalar_lea.sflag [#allocation5], %s1925_s30  ;;  %s2187_s9 = int_to_ptr.vmem [resolvable:$true] %s1087_s9 }
  0x5d   : > { %1304 = vmatprep.subr.bf16.mxu0 %v1444_v1  ;;  %1351 = vmatprep.subr.bf16.mxu1 %v1444_v1  ;;  %v1447_v6 = vld [vmem:[#allocation6 + $0x20] sm:$0xff]   ;;  %v1450_v9 = vld [vmem:[#allocation6 + $0x38] sm:$0xff]   ;;  %v1453_v10 = vld [vmem:[%s1929_s8 + $0x8] sm:$0xff]   ;;  %s1653_s26 = scalar_lea.vmem %s2187_s9, 4096  ;;  %s1745_s21 = smov [#allocation8]  }
  0x5e   : > { %1318 = vmatprep.mubr.bf16.mxu0 %v1451_v4  ;;  %1334 = vmatprep.mubr.bf16.mxu1 %v1452_v5  ;;  %v1454_v11 = vld [vmem:[%s1929_s8 + $0x48] sm:$0xff]   ;;  %v1455_v12 = vld [vmem:[%s1929_s8 + $0x10] sm:$0xff]   ;;  %v1457_v14 = vld [vmem:[%s1929_s8 + $0x18] sm:$0xff]   ;;  %p1654_p4 = scmp.ne.s32.totalorder %s2187_s9, %s1653_s26  ;;  %s1657_s4 = sshll.u32 %s1745_s21, 4  ;;  %s1658_s4 = int_to_ptr.vmem [resolvable:$false] %s1657_s4 }
  0x5f   : > { %v1456_v13 = vld [vmem:[%s1929_s8 + $0x50] sm:$0xff]   ;;  %v1458_v15 = vld [vmem:[%s1929_s8 + $0x58] sm:$0xff]   ;;  %v1459_v16 = vld [vmem:[%s1929_s8 + $0x20] sm:$0xff]   ;;  %s1659_s6 = scalar_lea.vmem %s1658_s4, 8192  ;;  %p1660_p12 = scmp.lt.s32.totalorder %s2187_s9, %s1658_s4 }
  0x60   : > { %1305 = vmatpush3.bf16.msra.mxu0 %v1444_v1  ;;  %1359 = vmatpush3.bf16.msra.mxu1 %v1444_v1  ;;  %v1460_v17 = vld [vmem:[%s1929_s8 + $0x60] sm:$0xff]   ;;  %v1461_v18 = vld [vmem:[%s1929_s8 + $0x28] sm:$0xff]   ;;  %v1463_v20 = vld [vmem:[%s1929_s8 + $0x30] sm:$0xff]   ;;  %p1655_p6 = pnand %p1654_p4, %p1866_p11  ;;  %p1661_p10 = scmp.lt.s32.totalorder %s1659_s6, %s1653_s26 }
  0x61   : > { %1306 = vmatprep.subr.bf16.mxu0 %v1445_v2  ;;  %1352 = vmatprep.subr.bf16.mxu1 %v1445_v2  ;;  %v1462_v19 = vld [vmem:[%s1929_s8 + $0x68] sm:$0xff]   ;;  %v1464_v21 = vld [vmem:[%s1929_s8 + $0x70] sm:$0xff]   ;;  %v1465_v22 = vld [vmem:[%s1929_s8 + $0x38] sm:$0xff]  }
  0x62   : > { %v1466_v23 = vld [vmem:[%s1929_s8 + $0x78] sm:$0xff]   ;;  %v1958_v24 = vld [vmem:[%s2241_s2] ss:$0 sm:$0xff]  ;;  %p1656_p8 = pneg %p1655_p6  ;;  %p1662_p0 = por %p1661_p10, %p1660_p12 }
  0x64   : > { %1307 = vmatpush3.bf16.msra.mxu0 %v1445_v2  ;;  %1360 = vmatpush3.bf16.msra.mxu1 %v1445_v2  ;;  %p1663_p5 = pnand %p1662_p0, %p1656_p8 }
  0x65   : > { %1308 = vmatprep.subr.bf16.mxu0 %v1446_v3  ;;  %1353 = vmatprep.subr.bf16.mxu1 %v1446_v3 }
  0x68   : > { %1309 = vmatpush3.bf16.msra.mxu0 %v1446_v3  ;;  %1361 = vmatpush3.bf16.msra.mxu1 %v1446_v3 }
  0x69   : > { %1310 = vmatprep.subr.bf16.mxu0 %v1447_v6  ;;  %1354 = vmatprep.subr.bf16.mxu1 %v1447_v6 }
  0x6c   : > { %1311 = vmatpush3.bf16.msra.mxu0 %v1447_v6  ;;  %1362 = vmatpush3.bf16.msra.mxu1 %v1447_v6 }
  0x6d   : > { %1312 = vmatprep.subr.bf16.mxu0 %v1448_v7  ;;  %1355 = vmatprep.subr.bf16.mxu1 %v1448_v7 }
  0x70   : > { %1313 = vmatpush3.bf16.msra.mxu0 %v1448_v7  ;;  %1363 = vmatpush3.bf16.msra.mxu1 %v1448_v7 }
  0x71   : > { %1314 = vmatprep.subr.bf16.mxu0 %v1449_v8  ;;  %1356 = vmatprep.subr.bf16.mxu1 %v1449_v8 }
  0x74   : > { %1315 = vmatpush3.bf16.msra.mxu0 %v1449_v8  ;;  %1364 = vmatpush3.bf16.msra.mxu1 %v1449_v8 }
  0x75   : > { %1316 = vmatprep.subr.bf16.mxu0 %v1450_v9  ;;  %1357 = vmatprep.subr.bf16.mxu1 %v1450_v9 }
  0x78   : > { %1317 = vmatpush3.bf16.msra.mxu0 %v1450_v9  ;;  %1365 = vmatpush3.bf16.msra.mxu1 %v1450_v9 }
  0x7b   : > { %1319 = vmatmul.mubr.bf16.vlgmr.msra.gmra.mrb[0].mxu0 %v1453_v10  ;;  %1335 = vmatmul.mubr.bf16.vlgmr.msra.gmra.mrb[0].mxu1 %v1454_v11 }
  0x7c   : > { %1322 = vmatprep.mubr.bf16.mxu0 %v1455_v12  ;;  %1338 = vmatprep.mubr.bf16.mxu1 %v1456_v13 }
  0x83   : > { %1323 = vmatmul.mubr.bf16.gmra.mrb[4].mxu0 %v1457_v14  ;;  %1339 = vmatmul.mubr.bf16.gmra.mrb[4].mxu1 %v1458_v15 }
  0x84   : > { %1326 = vmatprep.mubr.bf16.mxu0 %v1459_v16  ;;  %1342 = vmatprep.mubr.bf16.mxu1 %v1460_v17 }
  0x8b   : > { %1327 = vmatmul.mubr.bf16.gmra.mrb[8].mxu0 %v1461_v18  ;;  %1343 = vmatmul.mubr.bf16.gmra.mrb[8].mxu1 %v1462_v19 }
  0x8c   : > { %1330 = vmatprep.mubr.bf16.mxu0 %v1463_v20  ;;  %1346 = vmatprep.mubr.bf16.mxu1 %v1464_v21 }
  0x93   : > { %1331 = vmatmul.mubr.bf16.gmra.mrb[12].mxu0 %v1465_v22  ;;  %1347 = vmatmul.mubr.bf16.gmra.mrb[12].mxu1 %v1466_v23 }
 0x14e   : > { %v1320_v25 = vpop.f32.mrb[0].mxu0  ;;  %v1336_v26 = vpop.f32.mrb[0].mxu1 }
 0x14f   : > { %v1961_v27 = vadd.f32 %v1320_v25, %v1958_v24  ;;  %v1964_v28 = vadd.f32 %v1336_v26, %v1958_v24  ;;  %v551_v29 = vpop.f32.mrb[1].mxu0  ;;  %v615_v30 = vpop.f32.mrb[1].mxu1 }
 0x150   : > { %v1967_v31 = vadd.f32 %v1958_v24, %v551_v29  ;;  %v1970_v32 = vadd.f32 %v1958_v24, %v615_v30  ;;  %v1321_v33 = vpop.f32.mrb[2].mxu0  ;;  %v1337_v34 = vpop.f32.mrb[2].mxu1 }
 0x151   : > { %v1241_v35 = vmul.f32 -1.442695, %v1961_v27  ;;  %v1257_v36 = vmul.f32 -1.442695, %v1964_v28  ;;  %v1975_v37 = vadd.f32 %v1321_v33, %v1958_v24  ;;  %v1978_v38 = vadd.f32 %v1337_v34, %v1958_v24  ;;  %v554_v39 = vpop.f32.mrb[3].mxu0  ;;  %v618_v40 = vpop.f32.mrb[3].mxu1 }
 0x152   : > { %v1239_v41 = vmul.f32 -1.442695, %v1967_v31  ;;  %v1255_v42 = vmul.f32 -1.442695, %v1970_v32  ;;  %v1983_v43 = vadd.f32 %v1958_v24, %v554_v39  ;;  %v1986_v44 = vadd.f32 %v1958_v24, %v618_v40 }
 0x153   : > { %1467 = vpow2.f32 %v1241_v35  ;;  %v1242_v45 = vmul.f32 -1.442695, %v1975_v37  ;;  %v1258_v46 = vmul.f32 -1.442695, %v1978_v38 }
 0x154   : > { %1469 = vpow2.f32 %v1257_v36  ;;  %v1240_v47 = vmul.f32 -1.442695, %v1983_v43  ;;  %v1256_v48 = vmul.f32 -1.442695, %v1986_v44 }
 0x155   : > { %1471 = vpow2.f32 %v1239_v41 }
 0x156   : > { %1473 = vpow2.f32 %v1255_v42  ;;  %v1324_v49 = vpop.f32.mrb[4].mxu0  ;;  %v1340_v50 = vpop.f32.mrb[4].mxu1 }
 0x157   : > { %1475 = vpow2.f32 %v1242_v45  ;;  %v1993_v51 = vadd.f32 %v1324_v49, %v1958_v24  ;;  %v1996_v52 = vadd.f32 %v1340_v50, %v1958_v24  ;;  %v567_v53 = vpop.f32.mrb[5].mxu0  ;;  %v631_v54 = vpop.f32.mrb[5].mxu1 }
 0x158   : > { %1477 = vpow2.f32 %v1258_v46  ;;  %v1999_v55 = vadd.f32 %v1958_v24, %v567_v53  ;;  %v2002_v56 = vadd.f32 %v1958_v24, %v631_v54  ;;  %v1325_v57 = vpop.f32.mrb[6].mxu0  ;;  %v1341_v58 = vpop.f32.mrb[6].mxu1 }
 0x159   : > { %1479 = vpow2.f32 %v1240_v47  ;;  %v1245_v59 = vmul.f32 -1.442695, %v1993_v51  ;;  %v1261_v60 = vmul.f32 -1.442695, %v1996_v52  ;;  %v2007_v61 = vadd.f32 %v1325_v57, %v1958_v24  ;;  %v570_v62 = vpop.f32.mrb[7].mxu0  ;;  %v634_v63 = vpop.f32.mrb[7].mxu1 }
 0x15a   : > { %1481 = vpow2.f32 %v1256_v48  ;;  %v1243_v0 = vmul.f32 -1.442695, %v1999_v55  ;;  %v1259_v1 = vmul.f32 -1.442695, %v2002_v56  ;;  %v2019_v33 = vadd.f32 %v1341_v58, %v1958_v24 }
 0x15b   : > { %1483 = vpow2.f32 %v1245_v59  ;;  %v1246_v2 = vmul.f32 -1.442695, %v2007_v61  ;;  %v2022_v36 = vadd.f32 %v1958_v24, %v570_v62  ;;  %v2026_v42 = vadd.f32 %v1958_v24, %v634_v63 }
 0x15c   : > { %1485 = vpow2.f32 %v1261_v60  ;;  %v1262_v58 = vmul.f32 -1.442695, %v2019_v33 }
 0x15d   : > { %v1468_v3 = vpop.eup %1467  ;;  %1487 = vpow2.f32 %v1243_v0 }
 0x15e   : > { %v1470_v4 = vpop.eup %1469  ;;  %v914_v5 = vadd.f32 1.0, %v1468_v3  ;;  %1489 = vpow2.f32 %v1259_v1  ;;  %v1328_v6 = vpop.f32.mrb[8].mxu0  ;;  %v1244_v1 = vmul.f32 -1.442695, %v2022_v36 }
 0x15f   : > { %v1344_v7 = vpop.f32.mrb[8].mxu1  ;;  %v1472_v8 = vpop.eup %1471  ;;  %v930_v9 = vadd.f32 1.0, %v1470_v4  ;;  %1491 = vpow2.f32 %v1246_v2  ;;  %v2031_v49 = vadd.f32 %v1328_v6, %v1958_v24  ;;  %v1260_v6 = vmul.f32 -1.442695, %v2026_v42 }
 0x160   : > { %v583_v10 = vpop.f32.mrb[9].mxu0  ;;  %v647_v11 = vpop.f32.mrb[9].mxu1  ;;  %1493 = vrcp.f32 %v914_v5  ;;  %v912_v13 = vadd.f32 1.0, %v1472_v8  ;;  %v2039_v59 = vadd.f32 %v1344_v7, %v1958_v24 }
 0x161   : > { %v1474_v12 = vpop.eup %1473  ;;  %v1329_v14 = vpop.f32.mrb[10].mxu0  ;;  %1495 = vrcp.f32 %v930_v9  ;;  %v2047_v2 = vadd.f32 %v1958_v24, %v583_v10  ;;  %v2054_v7 = vadd.f32 %v1958_v24, %v647_v11 }
 0x162   : > { %v2012_v15 = vpop.f32.mrb[10].mxu1  ;;  %v1476_v16 = vpop.eup %1475  ;;  %v928_v17 = vadd.f32 1.0, %v1474_v12  ;;  %1497 = vrcp.f32 %v912_v13  ;;  %v1249_v12 = vmul.f32 -1.442695, %v2031_v49  ;;  %v2059_v10 = vadd.f32 %v1329_v14, %v1958_v24 }
 0x163   : > { %v2014_v18 = vpop.f32.mrb[11].mxu0  ;;  %v1478_v19 = vpop.eup %1477  ;;  %v915_v20 = vadd.f32 1.0, %v1476_v16  ;;  %v2070_v11 = vadd.f32 %v2012_v15, %v1958_v24  ;;  %v1263_v15 = vmul.f32 -1.442695, %v2054_v7 }
 0x164   : > { %v2016_v21 = vpop.f32.mrb[11].mxu1  ;;  %v1480_v22 = vpop.eup %1479  ;;  %1499 = vrcp.f32 %v928_v17  ;;  %v931_v23 = vadd.f32 1.0, %v1478_v19  ;;  %v1247_v17 = vmul.f32 -1.442695, %v2047_v2  ;;  %v2077_v19 = vadd.f32 %v1958_v24, %v2014_v18 }
 0x165   : > { %v1482_v25 = vpop.eup %1481  ;;  %1501 = vrcp.f32 %v915_v20  ;;  %v913_v26 = vadd.f32 1.0, %v1480_v22  ;;  %v2084_v22 = vadd.f32 %v1958_v24, %v2016_v21  ;;  %v1250_v18 = vmul.f32 -1.442695, %v2059_v10 }
 0x166   : > { %v1484_v29 = vpop.eup %1483  ;;  %1503 = vrcp.f32 %v931_v23  ;;  %v929_v30 = vadd.f32 1.0, %v1482_v25  ;;  %v1332_v39 = vpop.f32.mrb[12].mxu0  ;;  %v1266_v21 = vmul.f32 -1.442695, %v2070_v11 }
 0x167   : > { %v1486_v34 = vpop.eup %1485  ;;  %1505 = vrcp.f32 %v913_v26  ;;  %v918_v35 = vadd.f32 1.0, %v1484_v29  ;;  %v1348_v45 = vpop.f32.mrb[12].mxu1  ;;  %v2090_v25 = vadd.f32 %v1332_v39, %v1958_v24 }
 0x168   : > { %v1488_v40 = vpop.eup %1487  ;;  %1507 = vrcp.f32 %v929_v30  ;;  %v934_v41 = vadd.f32 1.0, %v1486_v34  ;;  %v2028_v46 = vpop.f32.mrb[13].mxu0  ;;  %v2096_v29 = vadd.f32 %v1348_v45, %v1958_v24  ;;  %v1248_v34 = vmul.f32 -1.442695, %v2077_v19 }
 0x169   : > { %v1490_v47 = vpop.eup %1489  ;;  %1509 = vrcp.f32 %v918_v35  ;;  %v916_v48 = vadd.f32 1.0, %v1488_v40  ;;  %v2033_v50 = vpop.f32.mrb[13].mxu1 }
 0x16a   : > { %v2035_v53 = vpop.f32.mrb[14].mxu0  ;;  %v1492_v54 = vpop.eup %1491  ;;  %1511 = vrcp.f32 %v934_v41  ;;  %v932_v57 = vadd.f32 1.0, %v1490_v47 }
 0x16b   : > { %v2041_v60 = vpop.f32.mrb[14].mxu1  ;;  %v2043_v62 = vpop.f32.mrb[15].mxu0  ;;  %1513 = vrcp.f32 %v916_v48  ;;  %v919_v0 = vadd.f32 1.0, %v1492_v54 }
 0x16c   : > { %v1494_v63 = vpop.eup %1493  ;;  %v2049_v3 = vpop.f32.mrb[15].mxu1  ;;  %1515 = vrcp.f32 %v932_v57 }
 0x16d   : > { %v1496_v4 = vpop.eup %1495  ;;  %v1010_v5 = vmul.f32 %v1494_v63, %v1961_v27  ;;  %1517 = vrcp.f32 %v919_v0 }
 0x16e   : > { %v1498_v8 = vpop.eup %1497  ;;  %v1026_v9 = vmul.f32 %v1496_v4, %v1964_v28  ;;  %1519 = vpow2.f32 %v1262_v58  ;;  %v1265_v28 = vmul.f32 -1.442695, %v2039_v59 }
 0x16f   : > { %v1500_v13 = vpop.eup %1499  ;;  %1042 = vst [vmem:[%s2063_s10 + $0x10] sm:$0xff] %v1010_v5  ;;  %v1008_v27 = vmul.f32 %v1498_v8, %v1967_v31  ;;  %1521 = vpow2.f32 %v1244_v1 }
 0x170   : > { %v1502_v14 = vpop.eup %1501  ;;  %1058 = vst [vmem:[%s2063_s10 + $0x90] sm:$0xff] %v1026_v9  ;;  %v1024_v16 = vmul.f32 %v1500_v13, %v1970_v32  ;;  %1523 = vpow2.f32 %v1260_v6 }
 0x171   : > { %v1504_v31 = vpop.eup %1503  ;;  %1040 = vst [vmem:[%s2063_s10] sm:$0xff] %v1008_v27  ;;  %v1011_v20 = vmul.f32 %v1502_v14, %v1975_v37  ;;  %1525 = vpow2.f32 %v1249_v12  ;;  %v2118_v14 = vadd.f32 %v1958_v24, %v2028_v46  ;;  %v2130_v46 = vadd.f32 %v2041_v60, %v1958_v24 }
 0x172   : > { %v1506_v32 = vpop.eup %1505  ;;  %1056 = vst [vmem:[%s2063_s10 + $0x80] sm:$0xff] %v1024_v16  ;;  %v1027_v23 = vmul.f32 %v1504_v31, %v1978_v38  ;;  %1527 = vpow2.f32 %v1265_v28  ;;  %v2122_v31 = vadd.f32 %v1958_v24, %v2033_v50  ;;  %v2140_v60 = vadd.f32 %v1958_v24, %v2049_v3 }
 0x173   : > { %v1508_v37 = vpop.eup %1507  ;;  %1043 = vst [vmem:[%s2063_s10 + $0x18] sm:$0xff] %v1011_v20  ;;  %v1009_v26 = vmul.f32 %v1506_v32, %v1983_v43  ;;  %1529 = vpow2.f32 %v1247_v17  ;;  %v1264_v43 = vmul.f32 -1.442695, %v2084_v22  ;;  %v2126_v32 = vadd.f32 %v2035_v53, %v1958_v24 }
 0x174   : > { %v1510_v30 = vpop.eup %1509  ;;  %1059 = vst [vmem:[%s2063_s10 + $0x98] sm:$0xff] %v1027_v23  ;;  %v1025_v38 = vmul.f32 %v1508_v37, %v1986_v44  ;;  %1531 = vpow2.f32 %v1263_v15  ;;  %v1253_v44 = vmul.f32 -1.442695, %v2090_v25  ;;  %v1251_v50 = vmul.f32 -1.442695, %v2118_v14 }
 0x175   : > { %v1512_v35 = vpop.eup %1511  ;;  %1041 = vst [vmem:[%s2063_s10 + $0x8] sm:$0xff] %v1009_v26  ;;  %v1014_v39 = vmul.f32 %v1510_v30, %v1993_v51  ;;  %1533 = vpow2.f32 %v1250_v18  ;;  %v1269_v51 = vmul.f32 -1.442695, %v2096_v29 }
 0x176   : > { %v1514_v40 = vpop.eup %1513  ;;  %1057 = vst [vmem:[%s2063_s10 + $0x88] sm:$0xff] %v1025_v38  ;;  %v1030_v41 = vmul.f32 %v1512_v35, %v1996_v52  ;;  %1535 = vpow2.f32 %v1266_v21  ;;  %v2135_v21 = vadd.f32 %v1958_v24, %v2043_v62  ;;  %v1267_v38 = vmul.f32 -1.442695, %v2122_v31 }
 0x177   : > { %v1516_v45 = vpop.eup %1515  ;;  %1046 = vst [vmem:[%s2063_s10 + $0x30] sm:$0xff] %v1014_v39  ;;  %v1012_v47 = vmul.f32 %v1514_v40, %v1999_v55  ;;  %1537 = vpow2.f32 %v1248_v34  ;;  %v1254_v39 = vmul.f32 -1.442695, %v2126_v32  ;;  %v1270_v40 = vmul.f32 -1.442695, %v2130_v46 }
 0x178   : > { %v1518_v48 = vpop.eup %1517  ;;  %1062 = vst [vmem:[%s2063_s10 + $0xb0] sm:$0xff] %v1030_v41  ;;  %v1028_v54 = vmul.f32 %v1516_v45, %v2002_v56  ;;  %1539 = vpow2.f32 %v1264_v43  ;;  %v1252_v24 = vmul.f32 -1.442695, %v2135_v21 }
 0x179   : > { %v1520_v57 = vpop.eup %1519  ;;  %1044 = vst [vmem:[%s2063_s10 + $0x20] sm:$0xff] %v1012_v47  ;;  %v1015_v52 = vmul.f32 %v1518_v48, %v2007_v61  ;;  %1541 = vpow2.f32 %v1253_v44 }
 0x17a   : > { %v1522_v58 = vpop.eup %1521  ;;  %1060 = vst [vmem:[%s2063_s10 + $0xa0] sm:$0xff] %v1028_v54  ;;  %v935_v63 = vadd.f32 1.0, %v1520_v57  ;;  %1543 = vpow2.f32 %v1269_v51 }
 0x17b   : > { %v1524_v0 = vpop.eup %1523  ;;  %1047 = vst [vmem:[%s2063_s10 + $0x38] sm:$0xff] %v1015_v52  ;;  %v917_v55 = vadd.f32 1.0, %v1522_v58 }
 0x17c   : > { %v1526_v1 = vpop.eup %1525  ;;  %1545 = vrcp.f32 %v935_v63  ;;  %v933_v4 = vadd.f32 1.0, %v1524_v0 }
 0x17d   : > { %v1528_v5 = vpop.eup %1527  ;;  %1547 = vrcp.f32 %v917_v55  ;;  %v922_v56 = vadd.f32 1.0, %v1526_v1 }
 0x17e   : > { %v1530_v6 = vpop.eup %1529  ;;  %1549 = vrcp.f32 %v933_v4  ;;  %v938_v8 = vadd.f32 1.0, %v1528_v5 }
 0x17f   : > { %v1532_v9 = vpop.eup %1531  ;;  %1551 = vrcp.f32 %v922_v56  ;;  %v920_v61 = vadd.f32 1.0, %v1530_v6 }
 0x180   : > { %v1534_v12 = vpop.eup %1533  ;;  %1553 = vrcp.f32 %v938_v8  ;;  %v936_v13 = vadd.f32 1.0, %v1532_v9 }
 0x181   : > { %v1536_v27 = vpop.eup %1535  ;;  %1555 = vrcp.f32 %v920_v61  ;;  %v923_v28 = vadd.f32 1.0, %v1534_v12 }
 0x182   : > { %v1538_v16 = vpop.eup %1537  ;;  %1557 = vrcp.f32 %v936_v13  ;;  %v939_v17 = vadd.f32 1.0, %v1536_v27 }
 0x183   : > { %v1540_v20 = vpop.eup %1539  ;;  %1559 = vrcp.f32 %v923_v28  ;;  %v921_v15 = vadd.f32 1.0, %v1538_v16 }
 0x184   : > { %v1542_v23 = vpop.eup %1541  ;;  %1561 = vrcp.f32 %v939_v17  ;;  %v937_v18 = vadd.f32 1.0, %v1540_v20 }
 0x185   : > { %v1544_v37 = vpop.eup %1543  ;;  %1563 = vrcp.f32 %v921_v15  ;;  %v926_v26 = vadd.f32 1.0, %v1542_v23 }
 0x186   : > { %v1546_v30 = vpop.eup %1545  ;;  %1565 = vrcp.f32 %v937_v18  ;;  %v942_v53 = vadd.f32 1.0, %v1544_v37 }
 0x187   : > { %v1548_v34 = vpop.eup %1547  ;;  %v1031_v35 = vmul.f32 %v1546_v30, %v2019_v33  ;;  %1567 = vrcp.f32 %v926_v26 }
 0x188   : > { %v1550_v43 = vpop.eup %1549  ;;  %v1013_v62 = vmul.f32 %v1548_v34, %v2022_v36  ;;  %1569 = vrcp.f32 %v942_v53  ;;  %v1268_v36 = vmul.f32 -1.442695, %v2140_v60 }
 0x189   : > { %v1552_v41 = vpop.eup %1551  ;;  %1063 = vst [vmem:[%s2063_s10 + $0xb8] sm:$0xff] %v1031_v35  ;;  %v1029_v44 = vmul.f32 %v1550_v43, %v2026_v42  ;;  %1571 = vpow2.f32 %v1251_v50 }
 0x18a   : > { %v1554_v33 = vpop.eup %1553  ;;  %1045 = vst [vmem:[%s2063_s10 + $0x28] sm:$0xff] %v1013_v62  ;;  %v1018_v3 = vmul.f32 %v1552_v41, %v2031_v49  ;;  %1573 = vpow2.f32 %v1267_v38 }
 0x18b   : > { %v1556_v45 = vpop.eup %1555  ;;  %1061 = vst [vmem:[%s2063_s10 + $0xa8] sm:$0xff] %v1029_v44  ;;  %v1034_v47 = vmul.f32 %v1554_v33, %v2039_v59  ;;  %1575 = vpow2.f32 %v1254_v39 }
 0x18c   : > { %v1558_v51 = vpop.eup %1557  ;;  %1050 = vst [vmem:[%s2063_s10 + $0x50] sm:$0xff] %v1018_v3  ;;  %v1016_v42 = vmul.f32 %v1556_v45, %v2047_v2  ;;  %1577 = vpow2.f32 %v1270_v40 }
 0x18d   : > { %v1560_v48 = vpop.eup %1559  ;;  %1066 = vst [vmem:[%s2063_s10 + $0xd0] sm:$0xff] %v1034_v47  ;;  %v1032_v49 = vmul.f32 %v1558_v51, %v2054_v7  ;;  %1579 = vpow2.f32 %v1252_v24 }
 0x18e   : > { %v1562_v54 = vpop.eup %1561  ;;  %1048 = vst [vmem:[%s2063_s10 + $0x40] sm:$0xff] %v1016_v42  ;;  %v1019_v57 = vmul.f32 %v1560_v48, %v2059_v10  ;;  %1581 = vpow2.f32 %v1268_v36 }
 0x18f   : > { %v1564_v59 = vpop.eup %1563  ;;  %1064 = vst [vmem:[%s2063_s10 + $0xc0] sm:$0xff] %v1032_v49  ;;  %v1035_v52 = vmul.f32 %v1562_v54, %v2070_v11 }
 0x190   : > { %v1566_v2 = vpop.eup %1565  ;;  %1051 = vst [vmem:[%s2063_s10 + $0x58] sm:$0xff] %v1019_v57  ;;  %v1017_v58 = vmul.f32 %v1564_v59, %v2077_v19 }
 0x191   : > { %v1568_v63 = vpop.eup %1567  ;;  %1067 = vst [vmem:[%s2063_s10 + $0xd8] sm:$0xff] %v1035_v52  ;;  %v1033_v7 = vmul.f32 %v1566_v2, %v2084_v22 }
 0x192   : > { %v1570_v0 = vpop.eup %1569  ;;  %1049 = vst [vmem:[%s2063_s10 + $0x48] sm:$0xff] %v1017_v58  ;;  %v1022_v55 = vmul.f32 %v1568_v63, %v2090_v25 }
 0x193   : > { %v1572_v10 = vpop.eup %1571  ;;  %1065 = vst [vmem:[%s2063_s10 + $0xc8] sm:$0xff] %v1033_v7  ;;  %v1038_v1 = vmul.f32 %v1570_v0, %v2096_v29 }
 0x194   : > { %v1574_v4 = vpop.eup %1573  ;;  %1054 = vst [vmem:[%s2063_s10 + $0x70] sm:$0xff] %v1022_v55  ;;  %v924_v11 = vadd.f32 1.0, %v1572_v10 }
 0x195   : > { %v1576_v5 = vpop.eup %1575  ;;  %1070 = vst [vmem:[%s2063_s10 + $0xf0] sm:$0xff] %v1038_v1  ;;  %v940_v56 = vadd.f32 1.0, %v1574_v4 }
 0x196   : > { %v1578_v6 = vpop.eup %1577  ;;  %1583 = vrcp.f32 %v924_v11  ;;  %v927_v19 = vadd.f32 1.0, %v1576_v5 }
 0x197   : > { %v1580_v8 = vpop.eup %1579  ;;  %1585 = vrcp.f32 %v940_v56  ;;  %v943_v22 = vadd.f32 1.0, %v1578_v6 }
 0x198   : > { %v1582_v25 = vpop.eup %1581  ;;  %1587 = vrcp.f32 %v927_v19  ;;  %v925_v9 = vadd.f32 1.0, %v1580_v8 }
 0x199   : > { %1589 = vrcp.f32 %v943_v22  ;;  %v941_v29 = vadd.f32 1.0, %v1582_v25 }
 0x19a   : > { %1591 = vrcp.f32 %v925_v9 }
 0x19b   : > { %1593 = vrcp.f32 %v941_v29 }
 0x1a0   : > { %v1584_v61 = vpop.eup %1583 }
 0x1a1   : > { %v1586_v12 = vpop.eup %1585  ;;  %v1020_v13 = vmul.f32 %v1584_v61, %v2118_v14 }
 0x1a2   : > { %v1588_v27 = vpop.eup %1587  ;;  %v1036_v28 = vmul.f32 %v1586_v12, %v2122_v31 }
 0x1a3   : > { %v1590_v16 = vpop.eup %1589  ;;  %1052 = vst [vmem:[%s2063_s10 + $0x60] sm:$0xff] %v1020_v13  ;;  %v1023_v17 = vmul.f32 %v1588_v27, %v2126_v32 }
 0x1a4   : > { %v1592_v20 = vpop.eup %1591  ;;  %1068 = vst [vmem:[%s2063_s10 + $0xe0] sm:$0xff] %v1036_v28  ;;  %v1039_v15 = vmul.f32 %v1590_v16, %v2130_v46 }
 0x1a5   : > { %v1594_v23 = vpop.eup %1593  ;;  %1055 = vst [vmem:[%s2063_s10 + $0x78] sm:$0xff] %v1023_v17  ;;  %v1021_v14 = vmul.f32 %v1592_v20, %v2135_v21 }
 0x1a6   : > { %1071 = vst [vmem:[%s2063_s10 + $0xf8] sm:$0xff] %v1039_v15  ;;  %v1037_v31 = vmul.f32 %v1594_v23, %v2140_v60 }
 0x1a7   : > { %1053 = vst [vmem:[%s2063_s10 + $0x68] sm:$0xff] %v1021_v14 }
 0x1a8   : > { %1069 = vst [vmem:[%s2063_s10 + $0xe8] sm:$0xff] %v1037_v31 }
 0x1a9   : > { %1666 = shalt.err (!%p1663_p5)
}
 0x1aa   : > { %s1667_s29 = scalar_lea.hbm %s2185_s15, 4096  ;;  %s1671_s20 = scalar_lea.hbm %s2242_s3, 32768 }
 0x1ab   : > { %p1668_p9 = scmp.ne.s32.totalorder %s2185_s15, %s1667_s29  ;;  %p1672_p3 = scmp.lt.u32.totalorder %s2185_s15, %s2242_s3 }
 0x1ac   : > { %p1673_p7 = scmp.lt.u32.totalorder %s1671_s20, %s1667_s29  ;;  %p1675_p4 = scmp.lt.u32.totalorder %s1667_s29, %s2185_s15 }
 0x1ad   : > { %p1669_p1 = pnand %p1668_p9, %p1866_p11 }
 0x1ae   : > { %p1674_p13 = por %p1673_p7, %p1672_p3 }
 0x1af   : > { %p1670_p2 = pneg %p1669_p1 }
 0x1b0   : > { %p1676_p6 = por %p1675_p4, %p1674_p13 }
 0x1b2   : > { %p1677_p8 = pnand %p1676_p6, %p1670_p2 }
 0x1b4   : > { %1680 = shalt.err (!%p1677_p8)
}
 0x1b5   : > { %s1746_s10 = smov 128   ;;  %s1747_s11 = smov 8  }
 0x1b6   : > { %1372 = dma.vmem_to_hbm [thread:$0]  (%p1866_p11), %s2187_s9, 4096, %s2185_s15, %s1073_s25, %s1746_s10, %s1746_s10, %s1747_s11  }
 0x1b7 PF: > { %p1389_p12 = scmp.ge.s32.totalorder %s1739_s17, 2  ;;  %s1102_s18 = sand.u32 1, %s1719_s12  }
 0x1b8   : > { %p2260_p10 = scmp.ne.s32.totalorder %s2250_s23, 0  ;;  %s1103_s19 = scalar_lea.sflag [#allocation5], %s1102_s18 }
 0x1ba   : > { %p1383_p0 = pnand %p1389_p12, %p2260_p10 }
 0x1bc   : > { %1714 = dma.done.wait (!%p1383_p0), %s1103_s19, 4096  }
 0x1bd   : > { %1716 = vsyncadd (!%p1383_p0), %s1103_s19, 4294963200  ;;  %s20_s17 = sadd.s32 1, %s1739_s17   ;;  %s2261_s12 = smov %s1723_s13 }
 0x1be   : > { %p17_p5 = scmp.ge.s32.totalorder %s20_s17, 10   ;;  %s2262_s13 = smov %s1727_s14 }
 0x1bf   : > { %s2263_s14 = smov %s1875_s5  ;;  %s2264_s15 = smov %s1735_s16 }
 0x1c0   : > { %s2265_s16 = smov %s2267_s28  ;;  %19 = sbr.rel (!%p17_p5) target bundleno = 7 (0x7), region = 93 }
 0x1c7   :  { %1108 = vsyncpa [#allocation4], 1 }
 0x1c8   :  { %1110 = vsyncpa [#allocation4 + $0x1], 1 }
 0x1c9   :  { %1111 = vsyncpa [#allocation7], 1 }
 0x1ca   :  { %1112 = vsyncpa [#allocation5], 1 }
 0x1cb   :  { %1114 = vsyncpa [#allocation5 + $0x1], 1 }

</bundles_post_ra>
